<compile_context>
chip_gen: v5e
topology: v5e:2x2
jax: 0.10.0
libtpu: 0.0.40
codegen_flags: <defaults>
</compile_context>

<pallas_src>
import functools

import jax
import jax.numpy as jnp
from jax.experimental import pallas as pl
from jax.experimental.pallas import tpu as pltpu

_LANES = 128
_SUBLANES = 8


def _round_up(x, m):
    return ((x + m - 1) // m) * m


def _pick_channel_tile(C, HW, TN, budget_bytes):
    """Largest channel tile that (a) divides C, (b) is a multiple of 8
    (or equals C), and (c) keeps the double-buffered f32 activation tile
    within `budget_bytes`."""
    per_channel = TN * HW * 4                      # f32 bytes per channel slab
    max_c = max(1, budget_bytes // (2 * per_channel))   # 2x for double buffer
    if C <= max_c:
        return C
    t = (max_c // _SUBLANES) * _SUBLANES
    while t >= _SUBLANES:
        if C % t == 0:
            return t
        t -= _SUBLANES
    return C  # fallback: single channel block (vmem_limit is raised anyway)


def swav_embed_kernel(x_ref, w_ref, b_ref, o_ref, acc_ref, *, inv_hw):
    """One (batch-tile, channel-tile) step of fused GAP + projection.

    x_ref:   (TN, TC, HW) f32  activation block (HW contiguous on lanes)
    w_ref:   (TC, Dp)     bf16 projection-weight block
    b_ref:   (1, Dp)      f32  bias (grid-invariant)
    o_ref:   (TN, Dp)     f32  embedding tile, float32 == `.float()`
    acc_ref: (TN, Dp)     f32  VMEM accumulator, resident across channel axis
    """
    c = pl.program_id(1)

    @pl.when(c == 0)
    def _init():
        acc_ref[...] = jnp.zeros_like(acc_ref)

    # Global average pool over HW in f32 (minor-axis reduce; VPU/XLU slots,
    # hidden under the HBM-bound activation stream).
    pooled = jnp.sum(x_ref[...], axis=-1) * inv_hw          # (TN, TC) f32

    # torch.cuda.amp.autocast emulation: bf16 operands, f32 MXU accumulation.
    acc_ref[...] += jnp.dot(pooled.astype(jnp.bfloat16), w_ref[...],
                            preferred_element_type=jnp.float32)

    @pl.when(c == pl.num_programs(1) - 1)
    def _finalize():
        # Bias add + float32 store (embedding.float()).
        o_ref[...] = acc_ref[...] + b_ref[...]


def swav_model_wrapper_forward(x_nchw, w, b, *, tn=128,
                               x_tile_budget_bytes=8 * 1024 * 1024):
    """Mirrors SwavModelWrapper.forward(x) for the synthetic GAP+linear model.

    x_nchw: (N, C, H, W) float32 input
    w:      (C, D)       float32 projection weight
    b:      (D,)         float32 projection bias
    returns (N, D) float32 embedding
    """
    N, C, H, W = x_nchw.shape
    HW = H * W
    D = w.shape[1]

    # ---- one-time, parameter-sized prep (no HW-fold, no weight inflation) --
    Dp = _round_up(max(D, _LANES), _LANES)                  # lane-dense D
    w_pad = jnp.pad(w.astype(jnp.float32),
                    ((0, 0), (0, Dp - D))).astype(jnp.bfloat16)   # (C, Dp)
    b_pad = jnp.pad(b.astype(jnp.float32), (0, Dp - D)).reshape(1, Dp)

    # ---- activation: metadata-only reshape, no dtype copy ------------------
    x3 = x_nchw.reshape(N, C, HW)

    TN = min(tn, _round_up(N, _SUBLANES))
    Npad = _round_up(N, TN)
    if Npad != N:
        x3 = jnp.pad(x3, ((0, Npad - N), (0, 0), (0, 0)))
    TC = _pick_channel_tile(C, HW, TN, x_tile_budget_bytes)

    grid = (Npad // TN, C // TC)

    kernel = functools.partial(swav_embed_kernel, inv_hw=float(1.0 / HW))

    out = pl.pallas_call(
        kernel,
        out_shape=jax.ShapeDtypeStruct((Npad, Dp), jnp.float32),
        grid_spec=pltpu.PrefetchScalarGridSpec(
            num_scalar_prefetch=0,
            grid=grid,
            in_specs=[
                # activations: (TN, TC, HW); HW full, contiguous HBM runs
                pl.BlockSpec((TN, TC, HW), lambda i, c: (i, c, 0)),
                # projection weight block
                pl.BlockSpec((TC, Dp), lambda i, c: (c, 0)),
                # bias (grid-invariant)
                pl.BlockSpec((1, Dp), lambda i, c: (0, 0)),
            ],
            out_specs=pl.BlockSpec((TN, Dp), lambda i, c: (i, 0)),
            scratch_shapes=[pltpu.VMEM((TN, Dp), jnp.float32)],
        ),
        compiler_params=pltpu.CompilerParams(
            # Batch axis parallel (uses both TCs on v7x); channel reduction
            # last, arbitrary (output block resident as an accumulator).
            dimension_semantics=("parallel", "arbitrary"),
            # Headroom for bigger channel tiles; still inside v7x's 64 MiB.
            vmem_limit_bytes=48 * 1024 * 1024,
        ),
    )(x3, w_pad, b_pad)

    return out[:N, :D]


if __name__ == "__main__":
    # Small shapes consistent with an NCHW conv-style backbone input.
    N, C, H, W = 2, 4, 16, 16
    D = 32  # embedding dim of the synthetic SwAV backbone

    key = jax.random.PRNGKey(0)
    kx, kw, kb = jax.random.split(key, 3)

    x = jax.random.normal(kx, (N, C, H, W), dtype=jnp.float32)
    w = jax.random.normal(kw, (C, D), dtype=jnp.float32) * 0.1
    b = jax.random.normal(kb, (D,), dtype=jnp.float32) * 0.01

    emb = jax.block_until_ready(swav_model_wrapper_forward(x, w, b))

    # Pure-JAX reference with matching "autocast" numerics
    # (f32 pooling, bf16 matmul operands, f32 accumulation, f32 output).
    pooled = jnp.mean(x.reshape(N, C, H * W), axis=-1)                # f32 GAP
    ref = (jnp.dot(pooled.astype(jnp.bfloat16), w.astype(jnp.bfloat16),
                   preferred_element_type=jnp.float32)
           + b[None, :]).astype(jnp.float32)

    assert emb.shape == (N, D) and emb.dtype == jnp.float32
    assert jnp.allclose(emb, ref, atol=1e-2, rtol=1e-2), (
        float(jnp.max(jnp.abs(emb - ref))))
    print("KERNEL_OK")
</pallas_src>

<mosaic_0001>
module attributes {stable_mosaic.version = 11 : i64} {
  func.func @swav_embed_kernel(%arg0: i32, %arg1: i32, %arg2: memref<8x4x256xf32, #tpu.memory_space<vmem>>, %arg3: memref<4x128xbf16, #tpu.memory_space<vmem>>, %arg4: memref<1x128xf32, #tpu.memory_space<vmem>>, %arg5: memref<8x128xf32, #tpu.memory_space<vmem>>, %arg6: memref<8x128xf32, #tpu.memory_space<vmem>>) attributes {dimension_semantics = [#tpu.dimension_semantics<parallel>, #tpu.dimension_semantics<arbitrary>], iteration_bounds = array<i64: 1, 1>, scalar_prefetch = 0 : i64, scratch_operands = 1 : i64, tpu.core_type = #tpu.core_type<tc>, window_params = [{transform_indices = @transform_0, window_bounds = array<i64: 8, 4, 256>}, {transform_indices = @transform_1, window_bounds = array<i64: 4, 128>}, {pipeline_mode = #tpu.pipeline_mode<synchronous>, transform_indices = @transform_2, window_bounds = array<i64: 1, 128>}, {transform_indices = @transform_3, window_bounds = array<i64: 8, 128>}]} {
    %c0_i32 = arith.constant 0 : i32
    %0 = arith.cmpi eq, %arg1, %c0_i32 : i32
    %1 = arith.extui %0 : i1 to i32
    %c0_i32_0 = arith.constant 0 : i32
    %2 = arith.cmpi ne, %1, %c0_i32_0 : i32
    scf.if %2 {
      %cst_13 = arith.constant 0.000000e+00 : f32
      %16 = vector.broadcast %cst_13 : f32 to vector<8x128xf32>
      %c0_14 = arith.constant 0 : index
      %c0_15 = arith.constant 0 : index
      %17 = vector.load %arg6[%c0_14, %c0_15] : memref<8x128xf32, #tpu.memory_space<vmem>>, vector<8x128xf32>
      tpu.vector_store %arg6[%c0_14, %c0_15], %16 {strides = array<i32>} : memref<8x128xf32, #tpu.memory_space<vmem>>, vector<8x128xf32>,
    } else {
    }
    %c0 = arith.constant 0 : index
    %c0_1 = arith.constant 0 : index
    %c0_2 = arith.constant 0 : index
    %3 = vector.load %arg2[%c0, %c0_1, %c0_2] : memref<8x4x256xf32, #tpu.memory_space<vmem>>, vector<8x4x256xf32>
    %cst = arith.constant dense<0.000000e+00> : vector<8x4xf32>
    %4 = vector.multi_reduction <add>, %3, %cst [2] : vector<8x4x256xf32> to vector<8x4xf32>
    %cst_3 = arith.constant 3.906250e-03 : f32
    %5 = vector.broadcast %cst_3 : f32 to vector<8x4xf32>
    %6 = arith.mulf %4, %5 : vector<8x4xf32>
    %c0_4 = arith.constant 0 : index
    %c0_5 = arith.constant 0 : index
    %7 = vector.load %arg6[%c0_4, %c0_5] : memref<8x128xf32, #tpu.memory_space<vmem>>, vector<8x128xf32>
    %8 = arith.truncf %6 : vector<8x4xf32> to vector<8x4xbf16>
    %c0_6 = arith.constant 0 : index
    %c0_7 = arith.constant 0 : index
    %9 = vector.load %arg3[%c0_6, %c0_7] : memref<4x128xbf16, #tpu.memory_space<vmem>>, vector<4x128xbf16>
    %cst_8 = arith.constant dense<0.000000e+00> : vector<8x128xf32>
    %10 = tpu.matmul %8, %9, %cst_8 {dimension_numbers = #tpu.dot_dimension_numbers<[1], [0], [0], [1], [0, 0, 1, 1], [], []>} : vector<8x4xbf16>, vector<4x128xbf16>, vector<8x128xf32> -> vector<8x128xf32>
    %11 = arith.addf %7, %10 : vector<8x128xf32>
    %c0_9 = arith.constant 0 : index
    %c0_10 = arith.constant 0 : index
    %12 = vector.load %arg6[%c0_9, %c0_10] : memref<8x128xf32, #tpu.memory_space<vmem>>, vector<8x128xf32>
    tpu.vector_store %arg6[%c0_9, %c0_10], %11 {strides = array<i32>} : memref<8x128xf32, #tpu.memory_space<vmem>>, vector<8x128xf32>,
    %c0_i32_11 = arith.constant 0 : i32
    %13 = arith.cmpi eq, %arg1, %c0_i32_11 : i32
    %14 = arith.extui %13 : i1 to i32
    %c0_i32_12 = arith.constant 0 : i32
    %15 = arith.cmpi ne, %14, %c0_i32_12 : i32
    scf.if %15 {
      %c0_13 = arith.constant 0 : index
      %c0_14 = arith.constant 0 : index
      %16 = vector.load %arg6[%c0_13, %c0_14] : memref<8x128xf32, #tpu.memory_space<vmem>>, vector<8x128xf32>
      %c0_15 = arith.constant 0 : index
      %c0_16 = arith.constant 0 : index
      %17 = vector.load %arg4[%c0_15, %c0_16] : memref<1x128xf32, #tpu.memory_space<vmem>>, vector<1x128xf32>
      %18 = vector.broadcast %17 : vector<1x128xf32> to vector<8x128xf32>
      %19 = arith.addf %16, %18 : vector<8x128xf32>
      %c0_17 = arith.constant 0 : index
      %c0_18 = arith.constant 0 : index
      %20 = vector.load %arg5[%c0_17, %c0_18] : memref<8x128xf32, #tpu.memory_space<vmem>>, vector<8x128xf32>
      tpu.vector_store %arg5[%c0_17, %c0_18], %19 {strides = array<i32>} : memref<8x128xf32, #tpu.memory_space<vmem>>, vector<8x128xf32>,
    } else {
    }
    return
  }
  func.func @transform_0(%arg0: i32, %arg1: i32) -> (i32, i32, i32) {
    %c0_i32 = arith.constant 0 : i32
    %c0_i32_0 = arith.constant 0 : i32
    return %arg0, %arg1, %c0_i32 : i32, i32, i32
  }
  func.func @transform_1(%arg0: i32, %arg1: i32) -> (i32, i32) {
    %c0_i32 = arith.constant 0 : i32
    %c0_i32_0 = arith.constant 0 : i32
    return %arg1, %c0_i32 : i32, i32
  }
  func.func @transform_2(%arg0: i32, %arg1: i32) -> (i32, i32) {
    %c0_i32 = arith.constant 0 : i32
    %c0_i32_0 = arith.constant 0 : i32
    %c0_i32_1 = arith.constant 0 : i32
    return %c0_i32, %c0_i32_0 : i32, i32
  }
  func.func @transform_3(%arg0: i32, %arg1: i32) -> (i32, i32) {
    %c0_i32 = arith.constant 0 : i32
    %c0_i32_0 = arith.constant 0 : i32
    return %arg0, %c0_i32 : i32, i32
  }
}

</mosaic_0001>

<bundles_post_ra>
// kernel: tpu_custom_call.1
= control target key start
LH: loop header
LB: loop body
LE: loop exit
PB: predicated region body
PF: predicated region fallthrough
CT: control target
= control target key end

     0   :  { %8 = vsyncpa [#allocation4], 0  ;;  %s399_s0 = inlined_call_operand.hbm [shape: f32[8,4,256], index: 0, kind: input, shape index: {}]   ;;  %s400_s1 = inlined_call_operand.hbm [shape: bf16[4,128], index: 1, kind: input, shape index: {}]   ;;  %s401_s2 = inlined_call_operand.vmem [shape: f32[1,128], index: 2, kind: input, shape index: {}]   ;;  %s402_s3 = inlined_call_operand.hbm [shape: f32[8,128], index: 3, kind: output, shape index: {}]  }
   0x1   :  { %9 = vsyncpa [#allocation7], 0 }
   0x2   :  { %10 = vsyncpa [#allocation5], 0  ;;  %s15_s14 = sshll.u32 %s399_s0, 4  ;;  %s346_s15 = smov [#allocation3]   ;;  %s16_s14 = int_to_ptr.hbm [resolvable:$true] %s15_s14 }
   0x3   :  { %s17_s16 = sshll.u32 %s346_s15, 4  ;;  %s29_s19 = sshll.u32 %s400_s1, 4  ;;  %s18_s16 = int_to_ptr.vmem [resolvable:$true] %s17_s16  ;;  %s30_s19 = int_to_ptr.hbm [resolvable:$true] %s29_s19 }
   0x4   :  { %s347_s20 = smov 128   ;;  %s348_s21 = smov 8  }
   0x5   :  { %23 = dma.hbm_to_vmem [thread:$0]  %s16_s14, 1024, %s18_s16, [#allocation4], %s347_s20, %s347_s20, %s348_s21  }
   0x6   :  { %s349_s22 = smov [#allocation6]  }
   0x7   :  { %s31_s23 = sshll.u32 %s349_s22, 4  ;;  %s32_s23 = int_to_ptr.vmem [resolvable:$true] %s31_s23 }
   0x8   :  { %34 = dma.hbm_to_vmem [thread:$0]  %s30_s19, 32, %s32_s23, [#allocation7]  }
   0x9   :  { %340 = dma.done.wait [#allocation4], 1024  }
   0xa   :  { %341 = vsyncadd [#allocation4], 4294966272 }
   0xb   :  { %342 = dma.done.wait [#allocation7], 32  }
   0xc   :  { %343 = vsyncadd [#allocation7], 4294967264  ;;  %v51_v0 = vld [vmem:[#allocation3] sm:$0xff]  ;;  %v53_v1 = vld [vmem:[#allocation3 + $0x10] sm:$0xff]  ;;  %vm110_vm0 = vcmask 1043456   ;;  %vm214_vm1 = vcmask 1041408   ;;  %v185_v54 = vlaneseq }
   0xd   :  { %67 = vst [vmem:[#allocation1] ss:$2 sm:$0xff] %v51_v0  ;;  %v52_v2 = vld [vmem:[#allocation3 + $0x8] sm:$0xff]  ;;  %v54_v3 = vld [vmem:[#allocation3 + $0x18] sm:$0xff]  ;;  %v55_v4 = vld [vmem:[#allocation3 + $0x20] sm:$0xff]  ;;  %vm195_vm2 = vcmask 1041409  }
   0xe   :  { %75 = vst [vmem:[#allocation1 + $0x20] ss:$2 sm:$0xff] %v53_v1  ;;  %v57_v5 = vld [vmem:[#allocation3 + $0x30] sm:$0xff]  ;;  %v56_v10 = vld [vmem:[#allocation3 + $0x28] sm:$0xff]  ;;  %v58_v16 = vld [vmem:[#allocation3 + $0x38] sm:$0xff]  ;;  %v186_v62 = vand.u32 127, %v185_v54 }
   0xf   :  { %71 = vst [vmem:[#allocation1 + $0x10] ss:$2 sm:$0xff] %v52_v2  ;;  %v168_v48 = vld [vmem:[#allocation6] sm:$0x3]  ;;  %vm197_vm3 = vcmask 1042434   ;;  %vm199_vm4 = vcmask 1043459  }
  0x10   :  { %79 = vst [vmem:[#allocation1 + $0x30] ss:$2 sm:$0xff] %v54_v3  ;;  %v216_v49 = vsel %vm214_vm1, %v168_v48, 0  ;;  %vm201_vm5 = vcmask 1044484   ;;  %vm203_vm6 = vcmask 1045509   ;;  %vm205_vm7 = vcmask 1046534  }
  0x11   :  { %225 = vmatpush.bf16.msra.mxu0 %v216_v49  ;;  %vm207_vm8 = vcmask 1047559   ;;  %vm210_vm9 = vcmask 31744   ;;  %s350_s24 = smov [#allocation8]   ;;  %s250_s28 = sshll.u32 %s402_s3, 4  ;;  %s251_s28 = int_to_ptr.hbm [resolvable:$true] %s250_s28 }
  0x12   :  { %s248_s25 = sshll.u32 %s350_s24, 4  ;;  %s249_s25 = int_to_ptr.vmem [resolvable:$true] %s248_s25 }
  0x14   :  { %v68_v6 = vld.sshfl [vmem:[#allocation1] sm:$0xff pattern:$0x75316420]  ;;  %v69_v7 = vld.sshfl [vmem:[#allocation1 + $0x8] sm:$0xff pattern:$0x75316420] }
  0x15   :  { %v111_v8 = vsel %vm110_vm0, %v68_v6, 0.0  ;;  %v112_v9 = vsel %vm110_vm0, %v69_v7, 0.0  ;;  %82 = vst [vmem:[#allocation1] ss:$2 sm:$0xff] %v55_v4 }
  0x16   :  { %v113_v11 = vadd.f32 %v112_v9, %v111_v8  ;;  %v76_v12 = vld.sshfl [vmem:[#allocation1 + $0x20] sm:$0xff pattern:$0x75316420]  ;;  %v77_v13 = vld.sshfl [vmem:[#allocation1 + $0x28] sm:$0xff pattern:$0x75316420] }
  0x17   :  { %v121_v14 = vsel %vm110_vm0, %v76_v12, 0.0  ;;  %v122_v15 = vsel %vm110_vm0, %v77_v13, 0.0  ;;  %88 = vst [vmem:[#allocation1 + $0x20] ss:$2 sm:$0xff] %v57_v5 }
  0x18   :  { %114 = vadd.xlane.f32.xlu0 %v113_v11  ;;  %v123_v17 = vadd.f32 %v122_v15, %v121_v14  ;;  %v72_v18 = vld.sshfl [vmem:[#allocation1 + $0x10] sm:$0xff pattern:$0x75316420]  ;;  %v73_v19 = vld.sshfl [vmem:[#allocation1 + $0x18] sm:$0xff pattern:$0x75316420] }
  0x19   :  { %85 = vst [vmem:[#allocation1 + $0x10] ss:$2 sm:$0xff] %v56_v10  ;;  %v116_v20 = vsel %vm110_vm0, %v72_v18, 0.0  ;;  %v117_v21 = vsel %vm110_vm0, %v73_v19, 0.0 }
  0x1a   :  { %124 = vadd.xlane.f32.xlu1 %v123_v17  ;;  %v80_v22 = vld.sshfl [vmem:[#allocation1 + $0x30] sm:$0xff pattern:$0x75316420]  ;;  %v81_v23 = vld.sshfl [vmem:[#allocation1 + $0x38] sm:$0xff pattern:$0x75316420]  ;;  %v118_v26 = vadd.f32 %v117_v21, %v116_v20 }
  0x1b   :  { %91 = vst [vmem:[#allocation1 + $0x30] ss:$2 sm:$0xff] %v58_v16  ;;  %v126_v24 = vsel %vm110_vm0, %v80_v22, 0.0  ;;  %v127_v25 = vsel %vm110_vm0, %v81_v23, 0.0 }
  0x1c   :  { %v83_v27 = vld.sshfl [vmem:[#allocation1] sm:$0xff pattern:$0x75316420]  ;;  %v84_v28 = vld.sshfl [vmem:[#allocation1 + $0x8] sm:$0xff pattern:$0x75316420]  ;;  %v128_v32 = vadd.f32 %v127_v25, %v126_v24 }
  0x1d   :  { %v131_v29 = vsel %vm110_vm0, %v83_v27, 0.0  ;;  %v132_v30 = vsel %vm110_vm0, %v84_v28, 0.0 }
  0x1e   :  { %v133_v31 = vadd.f32 %v132_v30, %v131_v29  ;;  %v89_v33 = vld.sshfl [vmem:[#allocation1 + $0x20] sm:$0xff pattern:$0x75316420]  ;;  %v90_v34 = vld.sshfl [vmem:[#allocation1 + $0x28] sm:$0xff pattern:$0x75316420] }
  0x1f   :  { %v141_v39 = vsel %vm110_vm0, %v89_v33, 0.0  ;;  %v142_v40 = vsel %vm110_vm0, %v90_v34, 0.0 }
  0x20   :  { %119 = vadd.xlane.f32.xlu0 %v118_v26  ;;  %134 = vadd.xlane.f32.xlu2 %v133_v31  ;;  %v86_v35 = vld.sshfl [vmem:[#allocation1 + $0x10] sm:$0xff pattern:$0x75316420]  ;;  %v87_v36 = vld.sshfl [vmem:[#allocation1 + $0x18] sm:$0xff pattern:$0x75316420]  ;;  %v143_v46 = vadd.f32 %v142_v40, %v141_v39 }
  0x21   :  { %v136_v37 = vsel %vm110_vm0, %v86_v35, 0.0  ;;  %v137_v38 = vsel %vm110_vm0, %v87_v36, 0.0  ;;  %v267_v36 = vld [vmem:[%s401_s2] ss:$0 sm:$0xff] }
  0x22   :  { %129 = vadd.xlane.f32.xlu1 %v128_v32  ;;  %v92_v41 = vld.sshfl [vmem:[#allocation1 + $0x30] sm:$0xff pattern:$0x75316420]  ;;  %v93_v42 = vld.sshfl [vmem:[#allocation1 + $0x38] sm:$0xff pattern:$0x75316420]  ;;  %v138_v45 = vadd.f32 %v137_v38, %v136_v37 }
  0x23   :  { %v146_v43 = vsel %vm110_vm0, %v92_v41, 0.0  ;;  %v147_v44 = vsel %vm110_vm0, %v93_v42, 0.0 }
  0x24   :  { %v148_v47 = vadd.f32 %v147_v44, %v146_v43 }
  0x28   :  { %139 = vadd.xlane.f32.xlu2 %v138_v45  ;;  %144 = vadd.xlane.f32.xlu0 %v143_v46 }
  0x2a   :  { %149 = vadd.xlane.f32.xlu1 %v148_v47 }
  0x8b   :  { %v115_v50 = vpop.xlane.xlu0 %114 }
  0x8c   :  { %v151_v52 = vmul.f32 0.00390625, %v115_v50 }
  0x8d   :  { %v125_v51 = vpop.xlane.xlu1 %124 }
  0x8e   :  { %v153_v53 = vmul.f32 0.00390625, %v125_v51  ;;  %v160_v55 = vpack.c.bf16 %v151_v52, %v151_v52 }
  0x90   :  { %v162_v56 = vpack.c.bf16 %v153_v53, %v153_v53  ;;  %v177_v63 = vunpack.c.l.b16 %v160_v55 }
  0x92   :  { %v179_v2 = vunpack.c.l.b16 %v162_v56  ;;  %v187_v6 = vperm.slane %v177_v63, %v186_v62 }
  0x93   :  { %v120_v57 = vpop.xlane.xlu0 %119  ;;  %v135_v58 = vpop.xlane.xlu2 %134 }
  0x94   :  { %v152_v59 = vmul.f32 0.00390625, %v120_v57  ;;  %v155_v60 = vmul.f32 0.00390625, %v135_v58  ;;  %v189_v9 = vperm.slane %v179_v2, %v186_v62 }
  0x95   :  { %v130_v61 = vpop.xlane.xlu1 %129 }
  0x96   :  { %v161_v0 = vpack.c.bf16 %v152_v59, %v152_v59  ;;  %v154_v1 = vmul.f32 0.00390625, %v130_v61  ;;  %v164_v5 = vpack.c.bf16 %v155_v60, %v155_v60 }
  0x98   :  { %v178_v3 = vunpack.c.l.b16 %v161_v0  ;;  %v163_v4 = vpack.c.bf16 %v154_v1, %v154_v1  ;;  %v181_v16 = vunpack.c.l.b16 %v164_v5 }
  0x9a   :  { %v188_v7 = vperm.slane %v178_v3, %v186_v62  ;;  %v180_v8 = vunpack.c.l.b16 %v163_v4  ;;  %v191_v26 = vperm.slane %v181_v16, %v186_v62 }
  0x9b   :  { %v140_v10 = vpop.xlane.xlu2 %139  ;;  %v145_v11 = vpop.xlane.xlu0 %144 }
  0x9c   :  { %v196_v12 = vsel %vm195_vm2, %v188_v7, %v187_v6  ;;  %v190_v13 = vperm.slane %v180_v8, %v186_v62  ;;  %v156_v14 = vmul.f32 0.00390625, %v140_v10  ;;  %v157_v15 = vmul.f32 0.00390625, %v145_v11 }
  0x9d   :  { %v198_v17 = vsel %vm197_vm3, %v189_v9, %v196_v12  ;;  %v150_v18 = vpop.xlane.xlu1 %149 }
  0x9e   :  { %v165_v19 = vpack.c.bf16 %v156_v14, %v156_v14  ;;  %v166_v20 = vpack.c.bf16 %v157_v15, %v157_v15  ;;  %v158_v21 = vmul.f32 0.00390625, %v150_v18  ;;  %v200_v22 = vsel %vm199_vm4, %v190_v13, %v198_v17 }
  0x9f   :  { %v202_v30 = vsel %vm201_vm5, %v191_v26, %v200_v22 }
  0xa0   :  { %v182_v23 = vunpack.c.l.b16 %v165_v19  ;;  %v183_v24 = vunpack.c.l.b16 %v166_v20  ;;  %v167_v25 = vpack.c.bf16 %v158_v21, %v158_v21 }
  0xa2   :  { %v192_v27 = vperm.slane %v182_v23, %v186_v62  ;;  %v193_v28 = vperm.slane %v183_v24, %v186_v62  ;;  %v184_v29 = vunpack.c.l.b16 %v167_v25 }
  0xa4   :  { %v204_v31 = vsel %vm203_vm6, %v192_v27, %v202_v30  ;;  %v194_v32 = vperm.slane %v184_v29, %v186_v62 }
  0xa5   :  { %v206_v33 = vsel %vm205_vm7, %v193_v28, %v204_v31 }
  0xa6   :  { %v208_v34 = vsel %vm207_vm8, %v194_v32, %v206_v33 }
  0xa7   :  { %v209_v35 = vpack.c.b16 %v208_v34, %v208_v34 }
  0xa9   :  { %261 = vmatmul.msk.bf16.vlgmr.msra.gmra.mxu0 %vm210_vm9, %v209_v35 }
 0x126   :  { %v227_v37 = vpop.f32.mrf.mxu0 }
 0x127   :  { %v241_v38 = vadd.f32 %v267_v36, %v227_v37 }
 0x129   :  { %242 = vst [vmem:[#allocation8] sm:$0xff] %v241_v38 }
 0x12a   :  { %253 = dma.vmem_to_hbm [thread:$0]  %s249_s25, 128, %s251_s28, [#allocation5]  }
 0x12e   :  { %v229_v39 = vpop.f32.mrf.mxu0 }
 0x12f   :  { %344 = dma.done.wait [#allocation5], 128  }
 0x130   :  { %345 = vsyncadd [#allocation5], 4294967168 }
 0x131   :  { %258 = vsyncpa [#allocation4], 1 }
 0x132   :  { %259 = vsyncpa [#allocation7], 1 }
 0x133   :  { %260 = vsyncpa [#allocation5], 1 }

</bundles_post_ra>
